<compile_context>
chip_gen: v5e
topology: v5e:2x2
jax: 0.10.0
libtpu: 0.0.40
codegen_flags: <defaults>
</compile_context>

<pallas_src>
import functools

import jax
import jax.numpy as jnp
from jax import lax
from jax.experimental import pallas as pl
from jax.experimental.pallas import tpu as pltpu


# Contract x's feature dim (axis 1) with W's 'in' dim (axis 1 of (out, in)),
# i.e. x @ W.T, without materializing a transpose.
_DN = (((1,), (1,)), ((), ()))


def foonet_kernel(x_ref, w0_ref, w1_ref, w2_ref, o_ref):
    # Fused 3x (linear -> relu) on one (TB, N) batch tile.
    h = x_ref[...]                      # bf16 activations (TB, N)
    for w_ref in (w0_ref, w1_ref, w2_ref):
        a = lax.dot_general(h, w_ref[...], dimension_numbers=_DN,
                            preferred_element_type=jnp.float32)   # f32 acc on MXU
        h = jnp.maximum(a, 0.0).astype(x_ref.dtype)               # back to bf16 for next layer
    o_ref[...] = h.astype(o_ref.dtype)


@functools.partial(jax.jit, static_argnames=("tb", "compute_dtype"))
def _foonet_forward(x, weights, *, tb=128, compute_dtype=jnp.bfloat16):
    B, N = x.shape
    tb = min(tb, B)

    # One-time dtype cast (fused into the same jit); weights keep (out, in).
    x_c = x.astype(compute_dtype)
    w_c = [w.astype(compute_dtype) for w in weights]

    grid = (pl.cdiv(B, tb),)
    x_spec = pl.BlockSpec((tb, N), lambda i: (i, 0))
    w_spec = pl.BlockSpec((N, N), lambda i: (0, 0))   # VMEM-resident across batch tiles
    o_spec = pl.BlockSpec((tb, N), lambda i: (i, 0))

    return pl.pallas_call(
        foonet_kernel,
        out_shape=jax.ShapeDtypeStruct((B, N), jnp.float32),
        grid_spec=pltpu.PrefetchScalarGridSpec(
            num_scalar_prefetch=0,
            grid=grid,
            in_specs=[x_spec, w_spec, w_spec, w_spec],
            out_specs=o_spec,
        ),
        compiler_params=pltpu.CompilerParams(
            dimension_semantics=("parallel",),   # batch tiles are independent (megacore on v7x)
        ),
    )(x_c, *w_c)


def foonet_forward(x, weights, *, tb=128, compute_dtype=jnp.bfloat16):
    """x: (B, N) float32; weights: list of 3 arrays in PyTorch (out, in) layout.
    Returns (B, N) float32 = relu(relu(relu(x W0^T) W1^T) W2^T)."""
    # Host-side mirror of the PyTorch print; kept out of the traced hot path.
    print("\nbatch size in forward: {}".format(x.shape[0]))
    return _foonet_forward(x, list(weights), tb=tb, compute_dtype=compute_dtype)


if __name__ == "__main__":
    B = 256        # batch size (two 128-row tiles -> exercises the B-grid)
    N = 128        # neural_num
    LAYERS = 3

    key = jax.random.PRNGKey(0)
    kx, *kws = jax.random.split(key, 1 + LAYERS)

    x = jax.random.normal(kx, (B, N), dtype=jnp.float32)
    # Deterministic weight init (PyTorch-style uniform bound 1/sqrt(fan_in)).
    bound = 1.0 / (N ** 0.5)
    weights = [
        jax.random.uniform(k, (N, N), dtype=jnp.float32, minval=-bound, maxval=bound)
        for k in kws
    ]

    out = jax.block_until_ready(foonet_forward(x, weights))

    # Reference with the same bf16-operand / f32-accumulate math as the kernel.
    ref = x.astype(jnp.bfloat16)
    for w in weights:
        a = lax.dot_general(ref, w.astype(jnp.bfloat16), dimension_numbers=_DN,
                            preferred_element_type=jnp.float32)
        ref = jnp.maximum(a, 0.0).astype(jnp.bfloat16)
    ref = ref.astype(jnp.float32)
    assert jnp.allclose(out, ref, atol=2e-2, rtol=2e-2), "mismatch vs bf16 reference"

    # Loose sanity check against the original full-f32 math (bf16 quantization only).
    ref32 = x
    for w in weights:
        ref32 = jnp.maximum(ref32 @ w.T, 0.0)
    assert jnp.allclose(out, ref32, atol=1e-1, rtol=1e-1), "mismatch vs f32 reference"

    print("KERNEL_OK")
</pallas_src>

<mosaic_0001>
module attributes {stable_mosaic.version = 11 : i64} {
  func.func @foonet_kernel(%arg0: i32, %arg1: memref<128x128xbf16, #tpu.memory_space<vmem>>, %arg2: memref<128x128xbf16, #tpu.memory_space<vmem>>, %arg3: memref<128x128xbf16, #tpu.memory_space<vmem>>, %arg4: memref<128x128xbf16, #tpu.memory_space<vmem>>, %arg5: memref<128x128xf32, #tpu.memory_space<vmem>>) attributes {dimension_semantics = [#tpu.dimension_semantics<parallel>], iteration_bounds = array<i64: 2>, scalar_prefetch = 0 : i64, scratch_operands = 0 : i64, tpu.core_type = #tpu.core_type<tc>, window_params = [{transform_indices = @transform_0, window_bounds = array<i64: 128, 128>}, {pipeline_mode = #tpu.pipeline_mode<synchronous>, transform_indices = @transform_1, window_bounds = array<i64: 128, 128>}, {pipeline_mode = #tpu.pipeline_mode<synchronous>, transform_indices = @transform_2, window_bounds = array<i64: 128, 128>}, {pipeline_mode = #tpu.pipeline_mode<synchronous>, transform_indices = @transform_3, window_bounds = array<i64: 128, 128>}, {transform_indices = @transform_4, window_bounds = array<i64: 128, 128>}]} {
    %c0 = arith.constant 0 : index
    %c0_0 = arith.constant 0 : index
    %0 = vector.load %arg1[%c0, %c0_0] : memref<128x128xbf16, #tpu.memory_space<vmem>>, vector<128x128xbf16>
    %c0_1 = arith.constant 0 : index
    %c0_2 = arith.constant 0 : index
    %1 = vector.load %arg2[%c0_1, %c0_2] : memref<128x128xbf16, #tpu.memory_space<vmem>>, vector<128x128xbf16>
    %cst = arith.constant dense<0.000000e+00> : vector<128x128xf32>
    %2 = tpu.matmul %0, %1, %cst {dimension_numbers = #tpu.dot_dimension_numbers<[1], [1], [0], [0], [0, 0, 1, 0], [], []>} : vector<128x128xbf16>, vector<128x128xbf16>, vector<128x128xf32> -> vector<128x128xf32>
    %cst_3 = arith.constant 0.000000e+00 : f32
    %3 = vector.broadcast %cst_3 : f32 to vector<128x128xf32>
    %4 = arith.maximumf %2, %3 : vector<128x128xf32>
    %5 = arith.truncf %4 : vector<128x128xf32> to vector<128x128xbf16>
    %c0_4 = arith.constant 0 : index
    %c0_5 = arith.constant 0 : index
    %6 = vector.load %arg3[%c0_4, %c0_5] : memref<128x128xbf16, #tpu.memory_space<vmem>>, vector<128x128xbf16>
    %cst_6 = arith.constant dense<0.000000e+00> : vector<128x128xf32>
    %7 = tpu.matmul %5, %6, %cst_6 {dimension_numbers = #tpu.dot_dimension_numbers<[1], [1], [0], [0], [0, 0, 1, 0], [], []>} : vector<128x128xbf16>, vector<128x128xbf16>, vector<128x128xf32> -> vector<128x128xf32>
    %cst_7 = arith.constant 0.000000e+00 : f32
    %8 = vector.broadcast %cst_7 : f32 to vector<128x128xf32>
    %9 = arith.maximumf %7, %8 : vector<128x128xf32>
    %10 = arith.truncf %9 : vector<128x128xf32> to vector<128x128xbf16>
    %c0_8 = arith.constant 0 : index
    %c0_9 = arith.constant 0 : index
    %11 = vector.load %arg4[%c0_8, %c0_9] : memref<128x128xbf16, #tpu.memory_space<vmem>>, vector<128x128xbf16>
    %cst_10 = arith.constant dense<0.000000e+00> : vector<128x128xf32>
    %12 = tpu.matmul %10, %11, %cst_10 {dimension_numbers = #tpu.dot_dimension_numbers<[1], [1], [0], [0], [0, 0, 1, 0], [], []>} : vector<128x128xbf16>, vector<128x128xbf16>, vector<128x128xf32> -> vector<128x128xf32>
    %cst_11 = arith.constant 0.000000e+00 : f32
    %13 = vector.broadcast %cst_11 : f32 to vector<128x128xf32>
    %14 = arith.maximumf %12, %13 : vector<128x128xf32>
    %15 = arith.truncf %14 : vector<128x128xf32> to vector<128x128xbf16>
    %16 = arith.extf %15 : vector<128x128xbf16> to vector<128x128xf32>
    %c0_12 = arith.constant 0 : index
    %c0_13 = arith.constant 0 : index
    %17 = vector.load %arg5[%c0_12, %c0_13] : memref<128x128xf32, #tpu.memory_space<vmem>>, vector<128x128xf32>
    tpu.vector_store %arg5[%c0_12, %c0_13], %16 {strides = array<i32>} : memref<128x128xf32, #tpu.memory_space<vmem>>, vector<128x128xf32>,
    return
  }
  func.func @transform_0(%arg0: i32) -> (i32, i32) {
    %c0_i32 = arith.constant 0 : i32
    %c0_i32_0 = arith.constant 0 : i32
    return %arg0, %c0_i32 : i32, i32
  }
  func.func @transform_1(%arg0: i32) -> (i32, i32) {
    %c0_i32 = arith.constant 0 : i32
    %c0_i32_0 = arith.constant 0 : i32
    %c0_i32_1 = arith.constant 0 : i32
    return %c0_i32, %c0_i32_0 : i32, i32
  }
  func.func @transform_2(%arg0: i32) -> (i32, i32) {
    %c0_i32 = arith.constant 0 : i32
    %c0_i32_0 = arith.constant 0 : i32
    %c0_i32_1 = arith.constant 0 : i32
    return %c0_i32, %c0_i32_0 : i32, i32
  }
  func.func @transform_3(%arg0: i32) -> (i32, i32) {
    %c0_i32 = arith.constant 0 : i32
    %c0_i32_0 = arith.constant 0 : i32
    %c0_i32_1 = arith.constant 0 : i32
    return %c0_i32, %c0_i32_0 : i32, i32
  }
  func.func @transform_4(%arg0: i32) -> (i32, i32) {
    %c0_i32 = arith.constant 0 : i32
    %c0_i32_0 = arith.constant 0 : i32
    return %arg0, %c0_i32 : i32, i32
  }
}

</mosaic_0001>

<bundles_post_ra>
// kernel: _foonet_forward.1
= control target key start
LH: loop header
LB: loop body
LE: loop exit
PB: predicated region body
PF: predicated region fallthrough
CT: control target
= control target key end

     0   :  { %9 = vsyncpa [#allocation3], 0  ;;  %s1302_s0 = inlined_call_operand.vmem [shape: bf16[256,128], index: 0, kind: input, shape index: {}]   ;;  %s1303_s1 = inlined_call_operand.vmem [shape: bf16[128,128], index: 1, kind: input, shape index: {}]   ;;  %s1304_s2 = inlined_call_operand.vmem [shape: bf16[128,128], index: 2, kind: input, shape index: {}]   ;;  %s1305_s3 = inlined_call_operand.vmem [shape: bf16[128,128], index: 3, kind: input, shape index: {}]   ;;  %s1306_s4 = inlined_call_operand.hbm [shape: f32[256,128], index: 4, kind: output, shape index: {}]  }
   0x1   :  { %11 = vsyncpa [#allocation3 + $0x1], 0  ;;  %s1113_s15 = smov 0   ;;  %s1115_s16 = smov 0  }
   0x2   :  { %s1117_s17 = smov 0   ;;  %s1119_s18 = smov 0  }
   0x3 LB: > { %s1134_s19 = sadd.s32 4294967295, %s1084_s18   ;;  %s792_s20 = sadd.s32 4294967294, %s1084_s18   ;;  %s1084_s18 = sphi %s1119_s18, %s1312_s18   ;;  %s1080_s17 = sphi %s1117_s17, %s1311_s17   ;;  %s1076_s16 = sphi %s1115_s16, %s1310_s16   ;;  %s1072_s15 = sphi %s1113_s15, %s1309_s15  }
   0x4   : > { %s1138_s21 = sadd.s32 1, %s1084_s18   ;;  %s113_s22 = sadd.s32 1, %s1080_s17 }
   0x5   : > { %s110_s23 = ssub.s32 %s1084_s18, %s1138_s21  ;;  %p123_p0 = scmp.ne.s32.totalorder %s1080_s17, %s1076_s16 }
   0x6   : > { %p111_p1 = scmp.eq.s32.totalorder %s110_s23, 0  ;;  %p124_p2 = scmp.eq.s32.totalorder %s1134_s19, 1 }
   0x7   : > { %p129_p3 = scmp.ne.s32.totalorder %s1076_s16, %s1072_s15  ;;  %p130_p4 = scmp.eq.s32.totalorder %s792_s20, 1 }
   0x8   : > { %s1149_s24 = scalar_select %p111_p1, %s1080_s17, %s113_s22  }
   0x9   : > { %p1151_p5 = por %p124_p2, %p123_p0  ;;  %p1155_p6 = por %p130_p4, %p129_p3 }
   0xa   : > { %p795_p7 = scmp.ge.s32.totalorder %s1084_s18, 1  ;;  %p166_p8 = scmp.lt.s32.totalorder %s1084_s18, 3 }
   0xc   : > { %p167_p9 = pnand %p795_p7, %p166_p8 }
   0xd   : > { %s797_s13 = sshll.u32 (!%p167_p9), %s1134_s19, 4  ;;  %s189_s29 = sand.u32 (!%p167_p9), 1, %s1076_s16  }
   0xe   : > { %170 = sbr.rel (%p167_p9) target bundleno = 621 (0x26d), region = 36  ;;  %p193_p10 = scmp.lt.s32.totalorder (!%p167_p9), %s797_s13, 31 }
   0xf   : > { %s964_s6 = sshll.u32 (!%p167_p9), %s1134_s19, 7  ;;  %s715_s12 = scalar_lea.sflag (!%p167_p9), [#allocation3], %s189_s29 }
  0x10   : > { %s726_s9 = scalar_lea.hbm (!%p167_p9), %s1306_s4, %s964_s6  ;;  %s1042_s22 = scalar_lea.hbm (!%p167_p9), %s1306_s4, 256 }
  0x11   : > { %s729_s11 = sshll.u32 (!%p167_p9), %s726_s9, 4  ;;  %s730_s11 = int_to_ptr.hbm [resolvable:$true] %s729_s11 }
  0x13   : > { %v947_v0 = vld [vmem:[%s1303_s1 + $0x38] sm:$0xff]  ;;  %v946_v1 = vld [vmem:[%s1303_s1 + $0x30] sm:$0xff]  ;;  %v945_v2 = vld [vmem:[%s1303_s1 + $0x28] sm:$0xff]  ;;  %s1314_s13 = smov (!%p193_p10, %s797_s13), 31 }
  0x14   : > { %327 = vmatpush.bf16.xpose.msra.mxu0 %v947_v0  ;;  %965 = vmatpush.bf16.xpose.msra.mxu3 %v947_v0  ;;  %v944_v3 = vld [vmem:[%s1303_s1 + $0x20] sm:$0xff]  ;;  %v943_v4 = vld [vmem:[%s1303_s1 + $0x18] sm:$0xff]  ;;  %v942_v5 = vld [vmem:[%s1303_s1 + $0x10] sm:$0xff]  ;;  %s798_s27 = sshll.u32 %s1314_s13, 2  ;;  %s1036_s13 = sshra.s32 %s730_s11, 4  ;;  %s1037_s13 = int_to_ptr.hbm [resolvable:$true] %s1036_s13 }
  0x15   : > { %v941_v6 = vld [vmem:[%s1303_s1 + $0x8] sm:$0xff]  ;;  %v940_v7 = vld [vmem:[%s1303_s1] sm:$0xff]  ;;  %s1189_s30 = scalar_lea.vmem %s1302_s0, %s798_s27  ;;  %v955_v12 = vld [vmem:[%s1304_s2 + $0x38] sm:$0xff]  ;;  %s1038_s19 = scalar_lea.hbm %s1037_s13, 128 }
  0x16   : > { %v932_v8 = vld [vmem:[%s1189_s30] sm:$0xff]  ;;  %v933_v9 = vld [vmem:[%s1189_s30 + $0x8] sm:$0xff]  ;;  %v934_v10 = vld [vmem:[%s1189_s30 + $0x10] sm:$0xff]  ;;  %464 = vmatpush.bf16.xpose.msra.mxu1 %v955_v12  ;;  %p1039_p11 = scmp.ne.s32.totalorder %s1037_s13, %s1038_s19  ;;  %p1043_p0 = scmp.lt.s32.totalorder %s1037_s13, %s1306_s4 }
  0x17   : > { %v938_v11 = vld [vmem:[%s1189_s30 + $0x30] sm:$0xff]  ;;  %v935_v13 = vld [vmem:[%s1189_s30 + $0x18] sm:$0xff]  ;;  %v953_v16 = vld [vmem:[%s1304_s2 + $0x28] sm:$0xff]  ;;  %p1044_p1 = scmp.lt.s32.totalorder %s1042_s22, %s1038_s19 }
  0x18   : > { %v954_v14 = vld [vmem:[%s1304_s2 + $0x30] sm:$0xff]  ;;  %v939_v15 = vld [vmem:[%s1189_s30 + $0x38] sm:$0xff]  ;;  %v936_v17 = vld [vmem:[%s1189_s30 + $0x20] sm:$0xff]  ;;  %p1040_p12 = pnand %p1039_p11, %p1151_p5 }
  0x19   : > { %v952_v18 = vld [vmem:[%s1304_s2 + $0x20] sm:$0xff]  ;;  %v951_v19 = vld [vmem:[%s1304_s2 + $0x18] sm:$0xff]  ;;  %v937_v20 = vld [vmem:[%s1189_s30 + $0x28] sm:$0xff]  ;;  %s796_s30 = sshll.u32 %s189_s29, 7  ;;  %p1045_p2 = por %p1044_p1, %p1043_p0 }
  0x1a   : > { %v950_v21 = vld [vmem:[%s1304_s2 + $0x10] sm:$0xff]  ;;  %v949_v22 = vld [vmem:[%s1304_s2 + $0x8] sm:$0xff]  ;;  %v948_v23 = vld [vmem:[%s1304_s2] sm:$0xff]  ;;  %s1250_s5 = scalar_lea.vmem [#allocation2], %s796_s30  ;;  %p1041_p13 = pneg %p1040_p12 }
  0x1b   : > { %v963_v42 = vld [vmem:[%s1305_s3 + $0x38] sm:$0xff]  ;;  %v962_v48 = vld [vmem:[%s1305_s3 + $0x30] sm:$0xff]  ;;  %v961_v54 = vld [vmem:[%s1305_s3 + $0x28] sm:$0xff]  ;;  %s727_s10 = sshll.u32 %s1250_s5, 4  ;;  %s728_s10 = int_to_ptr.vmem [resolvable:$true] %s727_s10 }
  0x1c   : > { %328 = vmatpush.bf16.xpose.msra.mxu0 %v946_v1  ;;  %966 = vmatpush.bf16.xpose.msra.mxu3 %v946_v1  ;;  %v960_v59 = vld [vmem:[%s1305_s3 + $0x20] sm:$0xff]  ;;  %v959_v61 = vld [vmem:[%s1305_s3 + $0x18] sm:$0xff]  ;;  %p1046_p3 = pnand %p1045_p2, %p1041_p13 }
  0x1d   : > { %601 = vmatpush.bf16.xpose.msra.mxu2 %v963_v42 }
  0x1e   : > { %465 = vmatpush.bf16.xpose.msra.mxu1 %v954_v14 }
  0x24   : > { %329 = vmatpush.bf16.xpose.msra.mxu0 %v945_v2  ;;  %967 = vmatpush.bf16.xpose.msra.mxu3 %v945_v2  ;;  %v958_v2 = vld [vmem:[%s1305_s3 + $0x10] sm:$0xff] }
  0x25   : > { %602 = vmatpush.bf16.xpose.msra.mxu2 %v962_v48 }
  0x26   : > { %466 = vmatpush.bf16.xpose.msra.mxu1 %v953_v16 }
  0x2c   : > { %330 = vmatpush.bf16.xpose.msra.mxu0 %v944_v3  ;;  %968 = vmatpush.bf16.xpose.msra.mxu3 %v944_v3  ;;  %v957_v3 = vld [vmem:[%s1305_s3 + $0x8] sm:$0xff] }
  0x2d   : > { %603 = vmatpush.bf16.xpose.msra.mxu2 %v961_v54 }
  0x2e   : > { %467 = vmatpush.bf16.xpose.msra.mxu1 %v952_v18 }
  0x34   : > { %331 = vmatpush.bf16.xpose.msra.mxu0 %v943_v4  ;;  %969 = vmatpush.bf16.xpose.msra.mxu3 %v943_v4 }
  0x35   : > { %604 = vmatpush.bf16.xpose.msra.mxu2 %v960_v59 }
  0x36   : > { %468 = vmatpush.bf16.xpose.msra.mxu1 %v951_v19 }
  0x3c   : > { %332 = vmatpush.bf16.xpose.msra.mxu0 %v942_v5  ;;  %970 = vmatpush.bf16.xpose.msra.mxu3 %v942_v5 }
  0x3d   : > { %605 = vmatpush.bf16.xpose.msra.mxu2 %v959_v61 }
  0x3e   : > { %469 = vmatpush.bf16.xpose.msra.mxu1 %v950_v21 }
  0x44   : > { %333 = vmatpush.bf16.xpose.msra.mxu0 %v941_v6  ;;  %971 = vmatpush.bf16.xpose.msra.mxu3 %v941_v6 }
  0x45   : > { %606 = vmatpush.bf16.xpose.msra.mxu2 %v958_v2 }
  0x46   : > { %470 = vmatpush.bf16.xpose.msra.mxu1 %v949_v22 }
  0x4c   : > { %334 = vmatpush.bf16.xpose.msra.mxu0 %v940_v7  ;;  %972 = vmatpush.bf16.xpose.msra.mxu3 %v940_v7  ;;  %v956_v7 = vld [vmem:[%s1305_s3] sm:$0xff] }
  0x4d   : > { %607 = vmatpush.bf16.xpose.msra.mxu2 %v957_v3 }
  0x4e   : > { %471 = vmatpush.bf16.xpose.msra.mxu1 %v948_v23 }
  0x53   : > { %335 = vmatmul.bf16.vlgmr.msra.gmra.mxu0 %v932_v8  ;;  %365 = vmatmul.bf16.vlgmr.msra.gmra.mxu3 %v938_v11 }
  0x54   : > { %973 = vmatpush.bf16.xpose.msrb.mxu3 %v955_v12 }
  0x55   : > { %608 = vmatpush.bf16.xpose.msra.mxu2 %v956_v7 }
  0x5c   : > { %974 = vmatpush.bf16.xpose.msrb.mxu3 %v954_v14 }
  0x63   : > { %340 = vmatmul.bf16.gmra.mxu0 %v933_v9  ;;  %370 = vmatmul.bf16.gmra.mxu3 %v939_v15 }
  0x64   : > { %975 = vmatpush.bf16.xpose.msrb.mxu3 %v953_v16 }
  0x6c   : > { %976 = vmatpush.bf16.xpose.msrb.mxu3 %v952_v18 }
  0x73   : > { %345 = vmatmul.bf16.gmra.mxu0 %v934_v10 }
  0x74   : > { %977 = vmatpush.bf16.xpose.msrb.mxu3 %v951_v19 }
  0x7c   : > { %978 = vmatpush.bf16.xpose.msrb.mxu3 %v950_v21 }
  0x83   : > { %350 = vmatmul.bf16.gmra.mxu0 %v935_v13 }
  0x84   : > { %979 = vmatpush.bf16.xpose.msrb.mxu3 %v949_v22 }
  0x8c   : > { %980 = vmatpush.bf16.xpose.msrb.mxu3 %v948_v23 }
  0x93   : > { %355 = vmatmul.bf16.gmra.mxu0 %v936_v17 }
  0xa3   : > { %360 = vmatmul.bf16.gmra.mxu0 %v937_v20 }
  0xd0   : > { %v336_v24 = vpop.f32.mrf.mxu0 }
  0xd1   : > { %v376_v26 = vmax.f32 %v336_v24, 0.0 }
  0xd6   : > { %v366_v38 = vpop.f32.mrf.mxu3 }
  0xd7   : > { %v388_v4 = vmax.f32 %v366_v38, 0.0 }
  0xd8   : > { %v338_v25 = vpop.f32.mrf.mxu0 }
  0xd9   : > { %v377_v27 = vmax.f32 %v338_v25, 0.0 }
  0xdb   : > { %v392_v28 = vpack.c.bf16 %v377_v27, %v376_v26 }
  0xdd   : > { %472 = vmatmul.bf16.vlgmr.msra.gmra.mxu1 %v392_v28 }
  0xde   : > { %v368_v41 = vpop.f32.mrf.mxu3 }
  0xdf   : > { %v389_v5 = vmax.f32 %v368_v41, 0.0 }
  0xe0   : > { %v341_v29 = vpop.f32.mrf.mxu0 }
  0xe1   : > { %v378_v31 = vmax.f32 %v341_v29, 0.0  ;;  %v398_v6 = vpack.c.bf16 %v389_v5, %v388_v4 }
  0xe6   : > { %v371_v46 = vpop.f32.mrf.mxu3 }
  0xe7   : > { %v390_v50 = vmax.f32 %v371_v46, 0.0 }
  0xe8   : > { %v343_v30 = vpop.f32.mrf.mxu0 }
  0xe9   : > { %v379_v32 = vmax.f32 %v343_v30, 0.0 }
  0xeb   : > { %v393_v33 = vpack.c.bf16 %v379_v32, %v378_v31 }
  0xed   : > { %477 = vmatmul.bf16.gmra.mxu1 %v393_v33 }
  0xee   : > { %v373_v51 = vpop.f32.mrf.mxu3 }
  0xef   : > { %v391_v52 = vmax.f32 %v373_v51, 0.0 }
  0xf0   : > { %v346_v34 = vpop.f32.mrf.mxu0 }
  0xf1   : > { %v380_v36 = vmax.f32 %v346_v34, 0.0  ;;  %v399_v53 = vpack.c.bf16 %v391_v52, %v390_v50 }
  0xf3   : > { %507 = vmatmul.bf16.vlgmr.msrb.gmra.mxu3 %v399_v53 }
  0xf8   : > { %v348_v35 = vpop.f32.mrf.mxu0 }
  0xf9   : > { %v381_v37 = vmax.f32 %v348_v35, 0.0 }
  0xfb   : > { %v394_v39 = vpack.c.bf16 %v381_v37, %v380_v36 }
  0xfd   : > { %482 = vmatmul.bf16.gmra.mxu1 %v394_v39 }
 0x100   : > { %v351_v40 = vpop.f32.mrf.mxu0 }
 0x101   : > { %v382_v44 = vmax.f32 %v351_v40, 0.0 }
 0x108   : > { %v353_v43 = vpop.f32.mrf.mxu0 }
 0x109   : > { %v383_v45 = vmax.f32 %v353_v43, 0.0 }
 0x10b   : > { %v395_v47 = vpack.c.bf16 %v383_v45, %v382_v44 }
 0x10d   : > { %487 = vmatmul.bf16.gmra.mxu1 %v395_v47 }
 0x110   : > { %v356_v49 = vpop.f32.mrf.mxu0 }
 0x111   : > { %v384_v56 = vmax.f32 %v356_v49, 0.0 }
 0x118   : > { %v358_v55 = vpop.f32.mrf.mxu0 }
 0x119   : > { %v385_v57 = vmax.f32 %v358_v55, 0.0 }
 0x11b   : > { %v396_v58 = vpack.c.bf16 %v385_v57, %v384_v56 }
 0x11d   : > { %492 = vmatmul.bf16.gmra.mxu1 %v396_v58 }
 0x120   : > { %v361_v60 = vpop.f32.mrf.mxu0 }
 0x121   : > { %v386_v63 = vmax.f32 %v361_v60, 0.0 }
 0x128   : > { %v363_v62 = vpop.f32.mrf.mxu0 }
 0x129   : > { %v387_v0 = vmax.f32 %v363_v62, 0.0 }
 0x12b   : > { %v397_v1 = vpack.c.bf16 %v387_v0, %v386_v63 }
 0x12d   : > { %497 = vmatmul.bf16.gmra.mxu1 %v397_v1 }
 0x13d   : > { %502 = vmatmul.bf16.gmra.mxu1 %v398_v6 }
 0x15a   : > { %v473_v8 = vpop.f32.mrf.mxu1 }
 0x15b   : > { %v513_v10 = vmax.f32 %v473_v8, 0.0 }
 0x162   : > { %v475_v9 = vpop.f32.mrf.mxu1 }
 0x163   : > { %v514_v11 = vmax.f32 %v475_v9, 0.0 }
 0x165   : > { %v529_v12 = vpack.c.bf16 %v514_v11, %v513_v10 }
 0x167   : > { %609 = vmatmul.bf16.vlgmr.msra.gmra.mxu2 %v529_v12 }
 0x16a   : > { %v478_v13 = vpop.f32.mrf.mxu1 }
 0x16b   : > { %v515_v15 = vmax.f32 %v478_v13, 0.0 }
 0x172   : > { %v480_v14 = vpop.f32.mrf.mxu1 }
 0x173   : > { %v516_v16 = vmax.f32 %v480_v14, 0.0 }
 0x175   : > { %v530_v17 = vpack.c.bf16 %v516_v16, %v515_v15 }
 0x176   : > { %v508_v42 = vpop.f32.mrf.mxu3 }
 0x177   : > { %614 = vmatmul.bf16.gmra.mxu2 %v530_v17  ;;  %v527_v45 = vmax.f32 %v508_v42, 0.0 }
 0x17a   : > { %v483_v18 = vpop.f32.mrf.mxu1 }
 0x17b   : > { %v517_v20 = vmax.f32 %v483_v18, 0.0 }
 0x17e   : > { %v510_v44 = vpop.f32.mrf.mxu3 }
 0x17f   : > { %v528_v46 = vmax.f32 %v510_v44, 0.0 }
 0x181   : > { %v536_v47 = vpack.c.bf16 %v528_v46, %v527_v45 }
 0x182   : > { %v485_v19 = vpop.f32.mrf.mxu1 }
 0x183   : > { %v518_v21 = vmax.f32 %v485_v19, 0.0 }
 0x185   : > { %v531_v22 = vpack.c.bf16 %v518_v21, %v517_v20 }
 0x187   : > { %619 = vmatmul.bf16.gmra.mxu2 %v531_v22 }
 0x18a   : > { %v488_v23 = vpop.f32.mrf.mxu1 }
 0x18b   : > { %v519_v25 = vmax.f32 %v488_v23, 0.0 }
 0x192   : > { %v490_v24 = vpop.f32.mrf.mxu1 }
 0x193   : > { %v520_v26 = vmax.f32 %v490_v24, 0.0 }
 0x195   : > { %v532_v27 = vpack.c.bf16 %v520_v26, %v519_v25 }
 0x197   : > { %624 = vmatmul.bf16.gmra.mxu2 %v532_v27 }
 0x19a   : > { %v493_v28 = vpop.f32.mrf.mxu1 }
 0x19b   : > { %v521_v30 = vmax.f32 %v493_v28, 0.0 }
 0x1a2   : > { %v495_v29 = vpop.f32.mrf.mxu1 }
 0x1a3   : > { %v522_v31 = vmax.f32 %v495_v29, 0.0 }
 0x1a5   : > { %v533_v32 = vpack.c.bf16 %v522_v31, %v521_v30 }
 0x1a7   : > { %629 = vmatmul.bf16.gmra.mxu2 %v533_v32 }
 0x1aa   : > { %v498_v33 = vpop.f32.mrf.mxu1 }
 0x1ab   : > { %v523_v35 = vmax.f32 %v498_v33, 0.0 }
 0x1b2   : > { %v500_v34 = vpop.f32.mrf.mxu1 }
 0x1b3   : > { %v524_v36 = vmax.f32 %v500_v34, 0.0 }
 0x1b5   : > { %v534_v37 = vpack.c.bf16 %v524_v36, %v523_v35 }
 0x1b7   : > { %634 = vmatmul.bf16.gmra.mxu2 %v534_v37 }
 0x1ba   : > { %v503_v38 = vpop.f32.mrf.mxu1 }
 0x1bb   : > { %v525_v40 = vmax.f32 %v503_v38, 0.0 }
 0x1c2   : > { %v505_v39 = vpop.f32.mrf.mxu1 }
 0x1c3   : > { %v526_v41 = vmax.f32 %v505_v39, 0.0 }
 0x1c5   : > { %v535_v43 = vpack.c.bf16 %v526_v41, %v525_v40 }
 0x1c7   : > { %639 = vmatmul.bf16.gmra.mxu2 %v535_v43 }
 0x1d7   : > { %644 = vmatmul.bf16.gmra.mxu2 %v536_v47 }
 0x1ea   : > { %v610_v48 = vpop.f32.mrf.mxu2 }
 0x1eb   : > { %v650_v49 = vmax.f32 %v610_v48, 0.0 }
 0x1ed   : > { %v666_v50 = vpack.c.bf16 %v650_v49, %v650_v49 }
 0x1ef   : > { %v682_v51 = vunpack.c.l.bf16 %v666_v50 }
 0x1f1   : > { %698 = vst [vmem:[%s1250_s5] sm:$0xff] %v682_v51 }
 0x1f2   : > { %v612_v52 = vpop.f32.mrf.mxu2 }
 0x1f3   : > { %v651_v53 = vmax.f32 %v612_v52, 0.0 }
 0x1f5   : > { %v667_v54 = vpack.c.bf16 %v651_v53, %v651_v53 }
 0x1f7   : > { %v683_v55 = vunpack.c.l.bf16 %v667_v54 }
 0x1f9   : > { %699 = vst [vmem:[%s1250_s5 + $0x8] sm:$0xff] %v683_v55 }
 0x1fa   : > { %v615_v56 = vpop.f32.mrf.mxu2 }
 0x1fb   : > { %v652_v57 = vmax.f32 %v615_v56, 0.0 }
 0x1fd   : > { %v668_v58 = vpack.c.bf16 %v652_v57, %v652_v57 }
 0x1ff   : > { %v684_v59 = vunpack.c.l.bf16 %v668_v58 }
 0x201   : > { %700 = vst [vmem:[%s1250_s5 + $0x10] sm:$0xff] %v684_v59 }
 0x202   : > { %v617_v60 = vpop.f32.mrf.mxu2 }
 0x203   : > { %v653_v61 = vmax.f32 %v617_v60, 0.0 }
 0x205   : > { %v669_v62 = vpack.c.bf16 %v653_v61, %v653_v61 }
 0x207   : > { %v685_v63 = vunpack.c.l.bf16 %v669_v62 }
 0x209   : > { %701 = vst [vmem:[%s1250_s5 + $0x18] sm:$0xff] %v685_v63 }
 0x20a   : > { %v620_v0 = vpop.f32.mrf.mxu2 }
 0x20b   : > { %v654_v1 = vmax.f32 %v620_v0, 0.0 }
 0x20d   : > { %v670_v2 = vpack.c.bf16 %v654_v1, %v654_v1 }
 0x20f   : > { %v686_v3 = vunpack.c.l.bf16 %v670_v2 }
 0x211   : > { %702 = vst [vmem:[%s1250_s5 + $0x20] sm:$0xff] %v686_v3 }
 0x212   : > { %v622_v4 = vpop.f32.mrf.mxu2 }
 0x213   : > { %v655_v5 = vmax.f32 %v622_v4, 0.0 }
 0x215   : > { %v671_v6 = vpack.c.bf16 %v655_v5, %v655_v5 }
 0x217   : > { %v687_v7 = vunpack.c.l.bf16 %v671_v6 }
 0x219   : > { %703 = vst [vmem:[%s1250_s5 + $0x28] sm:$0xff] %v687_v7 }
 0x21a   : > { %v625_v8 = vpop.f32.mrf.mxu2 }
 0x21b   : > { %v656_v9 = vmax.f32 %v625_v8, 0.0 }
 0x21d   : > { %v672_v10 = vpack.c.bf16 %v656_v9, %v656_v9 }
 0x21f   : > { %v688_v11 = vunpack.c.l.bf16 %v672_v10 }
 0x221   : > { %704 = vst [vmem:[%s1250_s5 + $0x30] sm:$0xff] %v688_v11 }
 0x222   : > { %v627_v12 = vpop.f32.mrf.mxu2 }
 0x223   : > { %v657_v13 = vmax.f32 %v627_v12, 0.0 }
 0x225   : > { %v673_v14 = vpack.c.bf16 %v657_v13, %v657_v13 }
 0x227   : > { %v689_v15 = vunpack.c.l.bf16 %v673_v14 }
 0x229   : > { %705 = vst [vmem:[%s1250_s5 + $0x38] sm:$0xff] %v689_v15 }
 0x22a   : > { %v630_v16 = vpop.f32.mrf.mxu2 }
 0x22b   : > { %v658_v17 = vmax.f32 %v630_v16, 0.0 }
 0x22d   : > { %v674_v18 = vpack.c.bf16 %v658_v17, %v658_v17 }
 0x22f   : > { %v690_v19 = vunpack.c.l.bf16 %v674_v18 }
 0x231   : > { %706 = vst [vmem:[%s1250_s5 + $0x40] sm:$0xff] %v690_v19 }
 0x232   : > { %v632_v20 = vpop.f32.mrf.mxu2 }
 0x233   : > { %v659_v21 = vmax.f32 %v632_v20, 0.0 }
 0x235   : > { %v675_v22 = vpack.c.bf16 %v659_v21, %v659_v21 }
 0x237   : > { %v691_v23 = vunpack.c.l.bf16 %v675_v22 }
 0x239   : > { %707 = vst [vmem:[%s1250_s5 + $0x48] sm:$0xff] %v691_v23 }
 0x23a   : > { %v635_v24 = vpop.f32.mrf.mxu2 }
 0x23b   : > { %v660_v25 = vmax.f32 %v635_v24, 0.0 }
 0x23d   : > { %v676_v26 = vpack.c.bf16 %v660_v25, %v660_v25 }
 0x23f   : > { %v692_v27 = vunpack.c.l.bf16 %v676_v26 }
 0x241   : > { %708 = vst [vmem:[%s1250_s5 + $0x50] sm:$0xff] %v692_v27 }
 0x242   : > { %v637_v28 = vpop.f32.mrf.mxu2 }
 0x243   : > { %v661_v29 = vmax.f32 %v637_v28, 0.0 }
 0x245   : > { %v677_v30 = vpack.c.bf16 %v661_v29, %v661_v29 }
 0x247   : > { %v693_v31 = vunpack.c.l.bf16 %v677_v30 }
 0x249   : > { %709 = vst [vmem:[%s1250_s5 + $0x58] sm:$0xff] %v693_v31 }
 0x24a   : > { %v640_v32 = vpop.f32.mrf.mxu2 }
 0x24b   : > { %v662_v33 = vmax.f32 %v640_v32, 0.0 }
 0x24d   : > { %v678_v34 = vpack.c.bf16 %v662_v33, %v662_v33 }
 0x24f   : > { %v694_v35 = vunpack.c.l.bf16 %v678_v34 }
 0x251   : > { %710 = vst [vmem:[%s1250_s5 + $0x60] sm:$0xff] %v694_v35 }
 0x252   : > { %v642_v36 = vpop.f32.mrf.mxu2 }
 0x253   : > { %v663_v37 = vmax.f32 %v642_v36, 0.0 }
 0x255   : > { %v679_v38 = vpack.c.bf16 %v663_v37, %v663_v37 }
 0x257   : > { %v695_v39 = vunpack.c.l.bf16 %v679_v38 }
 0x259   : > { %711 = vst [vmem:[%s1250_s5 + $0x68] sm:$0xff] %v695_v39 }
 0x25a   : > { %v645_v40 = vpop.f32.mrf.mxu2 }
 0x25b   : > { %v664_v41 = vmax.f32 %v645_v40, 0.0 }
 0x25d   : > { %v680_v42 = vpack.c.bf16 %v664_v41, %v664_v41 }
 0x25f   : > { %v696_v43 = vunpack.c.l.bf16 %v680_v42 }
 0x261   : > { %712 = vst [vmem:[%s1250_s5 + $0x70] sm:$0xff] %v696_v43 }
 0x262   : > { %v647_v44 = vpop.f32.mrf.mxu2 }
 0x263   : > { %v665_v45 = vmax.f32 %v647_v44, 0.0 }
 0x265   : > { %v681_v46 = vpack.c.bf16 %v665_v45, %v665_v45 }
 0x267   : > { %v697_v47 = vunpack.c.l.bf16 %v681_v46 }
 0x269   : > { %713 = vst [vmem:[%s1250_s5 + $0x78] sm:$0xff] %v697_v47 }
 0x26a   : > { %1049 = shalt.err (!%p1046_p3)
}
 0x26b   : > { %s1086_s28 = smov 128   ;;  %s1087_s29 = smov 8  }
 0x26c   : > { %981 = dma.vmem_to_hbm [thread:$0]  (%p1151_p5), %s728_s10, 2048, %s730_s11, %s715_s12, %s1086_s28, %s1086_s28, %s1087_s29  }
 0x26d PF: > { %p987_p4 = scmp.ge.s32.totalorder %s1084_s18, 2  ;;  %s744_s30 = sand.u32 1, %s1072_s15  }
 0x26e   : > { %s745_s5 = scalar_lea.sflag [#allocation3], %s744_s30 }
 0x26f   : > { %p984_p7 = pnand %p987_p4, %p1155_p6 }
 0x271   : > { %p985_p8 = pneg %p984_p7 }
 0x273   : > { %1067 = dma.done.wait (%p985_p8), %s745_s5, 2048  }
 0x274   : > { %1069 = vsyncadd (%p985_p8), %s745_s5, 4294965248  ;;  %p14_p9 = scmp.ge.s32.totalorder %s1138_s21, 4   ;;  %s1309_s15 = smov %s1076_s16 }
 0x275   : > { %s1310_s16 = smov %s1080_s17  ;;  %s1311_s17 = smov %s1149_s24 }
 0x276   : > { %s1312_s18 = smov %s1138_s21  ;;  %16 = sbr.rel (!%p14_p9) target bundleno = 3 (0x3), region = 71 }
 0x27b   :  { %751 = vsyncpa [#allocation3], 1 }
 0x27c   :  { %753 = vsyncpa [#allocation3 + $0x1], 1 }

</bundles_post_ra>
